<compile_context>
chip_gen: v7x
topology: tpu7x:2x2x1
jax: 0.10.0
libtpu: 0.0.40
codegen_flags: <defaults>
</compile_context>

<pallas_src>
import functools
import math

import jax
import jax.numpy as jnp
from jax.experimental import pallas as pl
from jax.experimental.pallas import tpu as pltpu


def _make_kernel(eps=1e-5):
    bf16 = jnp.bfloat16
    DN_NN = (((1,), (0,)), ((), ()))   # A(m,k) @ B(k,n)
    DN_NT = (((1,), (1,)), ((), ()))   # A(m,k) @ B(n,k)^T  (no materialized transpose)

    def kernel(x_ref, mask_ref,
               wq_ref, bq_ref, wk_ref, bk_ref, wv_ref, bv_ref, wo_ref, bo_ref,
               lnw_ref, lnb_ref,
               w1_ref, b1_ref, w2_ref, b2_ref,
               o_ref,
               acc_ref, bias_ref):
        h = pl.program_id(1)
        n_h = pl.num_programs(1)

        x = x_ref[0]                       # (S, D) f32 residual stream
        x_bf = x.astype(bf16)

        @pl.when(h == 0)
        def _init():
            acc_ref[...] = jnp.zeros_like(acc_ref)
            # additive attention bias, built once per batch element
            m = mask_ref[0].astype(jnp.int32)
            bias_ref[...] = jnp.where(m > 0, jnp.float32(0.0), jnp.float32(-1e9))

        # ---- one head of attention (weights pre-sliced per head by BlockSpec) ----
        # projections: K = d_model contraction on the MXU, bf16 x bf16 -> f32
        q = jax.lax.dot_general(x_bf, wq_ref[0], DN_NN,
                                preferred_element_type=jnp.float32) + bq_ref[0]
        k = jax.lax.dot_general(x_bf, wk_ref[0], DN_NN,
                                preferred_element_type=jnp.float32) + bk_ref[0]
        v = jax.lax.dot_general(x_bf, wv_ref[0], DN_NN,
                                preferred_element_type=jnp.float32) + bv_ref[0]

        # scores = (q * scale) k^T ; scale already folded into wq/bq host-side
        s = jax.lax.dot_general(q.astype(bf16), k.astype(bf16), DN_NT,
                                preferred_element_type=jnp.float32)
        s = s + bias_ref[...]
        s = s - jnp.max(s, axis=-1, keepdims=True)
        e = jnp.exp(s)
        p = e * pl.reciprocal(jnp.sum(e, axis=-1, keepdims=True), approx=True)

        ctx = jax.lax.dot_general(p.astype(bf16), v.astype(bf16), DN_NN,
                                  preferred_element_type=jnp.float32)
        # fold this head straight into the output projection: no lane-axis concat
        acc_ref[...] += jax.lax.dot_general(ctx.astype(bf16), wo_ref[0], DN_NN,
                                            preferred_element_type=jnp.float32)

        # ---- after the last head: residual + LN + FFN + residual + LN ----
        @pl.when(h == n_h - 1)
        def _finalize():
            lnw = lnw_ref[...]             # (1, D) f32
            lnb = lnb_ref[...]             # (1, D) f32

            def layernorm(y):
                mu = jnp.mean(y, axis=-1, keepdims=True)
                d = y - mu
                var = jnp.mean(d * d, axis=-1, keepdims=True)
                return d * jax.lax.rsqrt(var + eps) * lnw + lnb

            attn_out = acc_ref[...] + bo_ref[...]
            x1 = layernorm(x + attn_out)

            h1 = jax.lax.dot_general(x1.astype(bf16), w1_ref[...], DN_NN,
                                     preferred_element_type=jnp.float32) + b1_ref[...]
            h1 = jnp.maximum(h1, 0.0)
            ffn = jax.lax.dot_general(h1.astype(bf16), w2_ref[...], DN_NN,
                                      preferred_element_type=jnp.float32) + b2_ref[...]

            o_ref[0] = layernorm(x1 + ffn).astype(o_ref.dtype)

    return kernel


def encoder_layer_pallas(x, mask, params, *, n_heads, d_k, d_v):
    B, S, D = x.shape
    (wq, bq, wk, bk, wv, bv, wo, bo, lnw, lnb, w1, b1, w2, b2) = params
    scale = 1.0 / math.sqrt(d_k)
    bf16 = jnp.bfloat16

    # Head-major weight layouts prepared OUTSIDE the kernel (cheap one-time
    # reshapes) so the kernel never slices/concats along the lane axis.
    # Softmax scale is folded into the Q projection.
    wq3 = (wq * scale).reshape(D, n_heads, d_k).transpose(1, 0, 2).astype(bf16)  # (H, D, dk)
    bq3 = (bq[0] * scale).reshape(n_heads, 1, d_k)                               # (H, 1, dk) f32
    wk3 = wk.reshape(D, n_heads, d_k).transpose(1, 0, 2).astype(bf16)            # (H, D, dk)
    bk3 = bk[0].reshape(n_heads, 1, d_k)
    wv3 = wv.reshape(D, n_heads, d_v).transpose(1, 0, 2).astype(bf16)            # (H, D, dv)
    bv3 = bv[0].reshape(n_heads, 1, d_v)
    wo3 = wo.reshape(n_heads, d_v, D).astype(bf16)                               # (H, dv, D)
    w1b = w1.astype(bf16)
    w2b = w2.astype(bf16)
    mask_i8 = (mask != 0).astype(jnp.int8)   # ship mask as int8: 4x less DMA than f32

    def head_spec(shape):
        return pl.BlockSpec((1,) + tuple(shape[1:]), lambda b, h: (h, 0, 0))

    def const_spec(shape):
        return pl.BlockSpec(tuple(shape), lambda b, h: (0,) * len(shape))

    kernel = _make_kernel()

    return pl.pallas_call(
        kernel,
        out_shape=jax.ShapeDtypeStruct((B, S, D), x.dtype),
        grid_spec=pltpu.PrefetchScalarGridSpec(
            num_scalar_prefetch=0,
            grid=(B, n_heads),                                  # head axis = reduction, last
            in_specs=[
                pl.BlockSpec((1, S, D), lambda b, h: (b, 0, 0)),  # x (resident across heads)
                pl.BlockSpec((1, S, S), lambda b, h: (b, 0, 0)),  # mask (int8)
                head_spec(wq3.shape), head_spec(bq3.shape),
                head_spec(wk3.shape), head_spec(bk3.shape),
                head_spec(wv3.shape), head_spec(bv3.shape),
                head_spec(wo3.shape),
                const_spec(bo.shape),
                const_spec(lnw.shape), const_spec(lnb.shape),
                const_spec(w1b.shape), const_spec(b1.shape),
                const_spec(w2b.shape), const_spec(b2.shape),
            ],
            out_specs=pl.BlockSpec((1, S, D), lambda b, h: (b, 0, 0)),
            scratch_shapes=[
                pltpu.VMEM((S, D), jnp.float32),   # attention-output accumulator (sum over heads)
                pltpu.VMEM((S, S), jnp.float32),   # additive mask bias, built once per batch elem
            ],
        ),
        compiler_params=pltpu.CompilerParams(
            dimension_semantics=("parallel", "arbitrary"),
            vmem_limit_bytes=48 * 1024 * 1024,
        ),
    )(x, mask_i8, wq3, bq3, wk3, bk3, wv3, bv3, wo3, bo, lnw, lnb, w1b, b1, w2b, b2)


def encoder_layer_ref(x, mask, params, *, n_heads, d_k, d_v, eps=1e-5):
    """Pure-JAX f32 reference with identical math, for verification."""
    (wq, bq, wk, bk, wv, bv, wo, bo, lnw, lnb, w1, b1, w2, b2) = params
    B, S, D = x.shape
    x = x.astype(jnp.float32)

    def ln(y):
        mu = jnp.mean(y, axis=-1, keepdims=True)
        var = jnp.mean((y - mu) ** 2, axis=-1, keepdims=True)
        return (y - mu) / jnp.sqrt(var + eps) * lnw[0] + lnb[0]

    q = x @ wq + bq[0]
    k = x @ wk + bk[0]
    v = x @ wv + bv[0]
    q = q.reshape(B, S, n_heads, d_k).transpose(0, 2, 1, 3)
    k = k.reshape(B, S, n_heads, d_k).transpose(0, 2, 1, 3)
    v = v.reshape(B, S, n_heads, d_v).transpose(0, 2, 1, 3)
    scores = jnp.einsum("bhqd,bhkd->bhqk", q, k) / math.sqrt(d_k)
    scores = jnp.where(mask[:, None, :, :] > 0, scores, -1e9)
    attn = jax.nn.softmax(scores, axis=-1)
    ctx = jnp.einsum("bhqk,bhkd->bhqd", attn, v).transpose(0, 2, 1, 3).reshape(B, S, n_heads * d_v)
    attn_out = ctx @ wo + bo[0]
    x1 = ln(x + attn_out)
    ffn = jnp.maximum(x1 @ w1 + b1[0], 0.0) @ w2 + b2[0]
    return ln(x1 + ffn)


def init_params(key, d_model, d_k, d_v, d_ffn, n_heads):
    keys = jax.random.split(key, 8)

    def lin(k, fan_in, fan_out):
        bound = 1.0 / math.sqrt(fan_in)
        w = jax.random.uniform(k, (fan_in, fan_out), jnp.float32, -bound, bound)
        b = jnp.zeros((1, fan_out), jnp.float32)
        return w, b

    wq, bq = lin(keys[0], d_model, n_heads * d_k)
    wk, bk = lin(keys[1], d_model, n_heads * d_k)
    wv, bv = lin(keys[2], d_model, n_heads * d_v)
    wo, bo = lin(keys[3], n_heads * d_v, d_model)
    lnw = jnp.ones((1, d_model), jnp.float32)
    lnb = jnp.zeros((1, d_model), jnp.float32)
    w1, b1 = lin(keys[4], d_model, d_ffn)
    w2, b2 = lin(keys[5], d_ffn, d_model)
    return (wq, bq, wk, bk, wv, bv, wo, bo, lnw, lnb, w1, b1, w2, b2)


if __name__ == "__main__":
    B, S = 2, 8
    d_model, d_k, d_v, d_ffn, n_heads = 32, 8, 8, 64, 4

    key = jax.random.PRNGKey(0)
    kx, kp, km = jax.random.split(key, 3)
    x = jax.random.normal(kx, (B, S, d_model), jnp.float32)
    # simple padding-style mask: last position of batch 1 masked out
    mask = jnp.ones((B, S, S), jnp.float32)
    mask = mask.at[1, :, -1].set(0.0)

    params = init_params(kp, d_model, d_k, d_v, d_ffn, n_heads)

    fn = functools.partial(encoder_layer_pallas, n_heads=n_heads, d_k=d_k, d_v=d_v)
    out = jax.jit(lambda a, m: fn(a, m, params))(x, mask)
    out = jax.block_until_ready(out)

    ref = encoder_layer_ref(x, mask, params, n_heads=n_heads, d_k=d_k, d_v=d_v)
    assert out.shape == (B, S, d_model)
    # kernel runs its matmuls in bf16 (f32 accumulation), so allow a loose tolerance
    assert jnp.allclose(out, ref, atol=5e-2, rtol=5e-2), "mismatch vs JAX reference"

    print("KERNEL_OK")
</pallas_src>

<mosaic_0001>
module attributes {stable_mosaic.version = 11 : i64} {
  func.func @kernel(%arg0: i32, %arg1: i32, %arg2: memref<1x8x32xf32, #tpu.memory_space<vmem>>, %arg3: memref<1x8x8xi8, #tpu.memory_space<vmem>>, %arg4: memref<1x32x8xbf16, #tpu.memory_space<vmem>>, %arg5: memref<1x1x8xf32, #tpu.memory_space<vmem>>, %arg6: memref<1x32x8xbf16, #tpu.memory_space<vmem>>, %arg7: memref<1x1x8xf32, #tpu.memory_space<vmem>>, %arg8: memref<1x32x8xbf16, #tpu.memory_space<vmem>>, %arg9: memref<1x1x8xf32, #tpu.memory_space<vmem>>, %arg10: memref<1x8x32xbf16, #tpu.memory_space<vmem>>, %arg11: memref<1x32xf32, #tpu.memory_space<vmem>>, %arg12: memref<1x32xf32, #tpu.memory_space<vmem>>, %arg13: memref<1x32xf32, #tpu.memory_space<vmem>>, %arg14: memref<32x64xbf16, #tpu.memory_space<vmem>>, %arg15: memref<1x64xf32, #tpu.memory_space<vmem>>, %arg16: memref<64x32xbf16, #tpu.memory_space<vmem>>, %arg17: memref<1x32xf32, #tpu.memory_space<vmem>>, %arg18: memref<1x8x32xf32, #tpu.memory_space<vmem>>, %arg19: memref<8x32xf32, #tpu.memory_space<vmem>>, %arg20: memref<8x8xf32, #tpu.memory_space<vmem>>) attributes {dimension_semantics = [#tpu.dimension_semantics<parallel>, #tpu.dimension_semantics<arbitrary>], iteration_bounds = array<i64: 2, 4>, scalar_prefetch = 0 : i64, scratch_operands = 2 : i64, tpu.core_type = #tpu.core_type<tc>, window_params = [{transform_indices = @transform_0, window_bounds = array<i64: 1, 8, 32>}, {transform_indices = @transform_1, window_bounds = array<i64: 1, 8, 8>}, {transform_indices = @transform_2, window_bounds = array<i64: 1, 32, 8>}, {transform_indices = @transform_3, window_bounds = array<i64: 1, 1, 8>}, {transform_indices = @transform_4, window_bounds = array<i64: 1, 32, 8>}, {transform_indices = @transform_5, window_bounds = array<i64: 1, 1, 8>}, {transform_indices = @transform_6, window_bounds = array<i64: 1, 32, 8>}, {transform_indices = @transform_7, window_bounds = array<i64: 1, 1, 8>}, {transform_indices = @transform_8, window_bounds = array<i64: 1, 8, 32>}, {pipeline_mode = #tpu.pipeline_mode<synchronous>, transform_indices = @transform_9, window_bounds = array<i64: 1, 32>}, {pipeline_mode = #tpu.pipeline_mode<synchronous>, transform_indices = @transform_10, window_bounds = array<i64: 1, 32>}, {pipeline_mode = #tpu.pipeline_mode<synchronous>, transform_indices = @transform_11, window_bounds = array<i64: 1, 32>}, {pipeline_mode = #tpu.pipeline_mode<synchronous>, transform_indices = @transform_12, window_bounds = array<i64: 32, 64>}, {pipeline_mode = #tpu.pipeline_mode<synchronous>, transform_indices = @transform_13, window_bounds = array<i64: 1, 64>}, {pipeline_mode = #tpu.pipeline_mode<synchronous>, transform_indices = @transform_14, window_bounds = array<i64: 64, 32>}, {pipeline_mode = #tpu.pipeline_mode<synchronous>, transform_indices = @transform_15, window_bounds = array<i64: 1, 32>}, {transform_indices = @transform_16, window_bounds = array<i64: 1, 8, 32>}]} {
    %c0 = arith.constant 0 : index
    %c0_0 = arith.constant 0 : index
    %c0_1 = arith.constant 0 : index
    %0 = vector.load %arg2[%c0, %c0_0, %c0_1] : memref<1x8x32xf32, #tpu.memory_space<vmem>>, vector<1x8x32xf32>
    %1 = vector.shape_cast %0 : vector<1x8x32xf32> to vector<8x32xf32>
    %2 = arith.truncf %1 : vector<8x32xf32> to vector<8x32xbf16>
    %c0_i32 = arith.constant 0 : i32
    %3 = arith.cmpi eq, %arg1, %c0_i32 : i32
    %4 = arith.extui %3 : i1 to i32
    %c0_i32_2 = arith.constant 0 : i32
    %5 = arith.cmpi ne, %4, %c0_i32_2 : i32
    scf.if %5 {
      %cst_38 = arith.constant 0.000000e+00 : f32
      %55 = vector.broadcast %cst_38 : f32 to vector<8x32xf32>
      %c0_39 = arith.constant 0 : index
      %c0_40 = arith.constant 0 : index
      %56 = vector.load %arg19[%c0_39, %c0_40] : memref<8x32xf32, #tpu.memory_space<vmem>>, vector<8x32xf32>
      tpu.vector_store %arg19[%c0_39, %c0_40], %55 {strides = array<i32>} : memref<8x32xf32, #tpu.memory_space<vmem>>, vector<8x32xf32>,
      %c0_41 = arith.constant 0 : index
      %c0_42 = arith.constant 0 : index
      %c0_43 = arith.constant 0 : index
      %57 = vector.load %arg3[%c0_41, %c0_42, %c0_43] : memref<1x8x8xi8, #tpu.memory_space<vmem>>, vector<1x8x8xi8>
      %58 = vector.shape_cast %57 : vector<1x8x8xi8> to vector<8x8xi8>
      %59 = arith.extsi %58 : vector<8x8xi8> to vector<8x8xi32>
      %c0_i32_44 = arith.constant 0 : i32
      %60 = vector.broadcast %c0_i32_44 : i32 to vector<8x8xi32>
      %61 = arith.cmpi sgt, %59, %60 : vector<8x8xi32>
      %cst_45 = arith.constant 0.000000e+00 : f32
      %cst_46 = arith.constant -1.000000e+09 : f32
      %62 = vector.broadcast %cst_45 : f32 to vector<8x8xf32>
      %63 = vector.broadcast %cst_46 : f32 to vector<8x8xf32>
      %64 = arith.select %61, %62, %63 : vector<8x8xi1>, vector<8x8xf32>
      %c0_47 = arith.constant 0 : index
      %c0_48 = arith.constant 0 : index
      %65 = vector.load %arg20[%c0_47, %c0_48] : memref<8x8xf32, #tpu.memory_space<vmem>>, vector<8x8xf32>
      tpu.vector_store %arg20[%c0_47, %c0_48], %64 {strides = array<i32>} : memref<8x8xf32, #tpu.memory_space<vmem>>, vector<8x8xf32>,
    } else {
    }
    %c0_3 = arith.constant 0 : index
    %c0_4 = arith.constant 0 : index
    %c0_5 = arith.constant 0 : index
    %6 = vector.load %arg4[%c0_3, %c0_4, %c0_5] : memref<1x32x8xbf16, #tpu.memory_space<vmem>>, vector<1x32x8xbf16>
    %7 = vector.shape_cast %6 : vector<1x32x8xbf16> to vector<32x8xbf16>
    %cst = arith.constant dense<0.000000e+00> : vector<8x8xf32>
    %8 = tpu.matmul %2, %7, %cst {dimension_numbers = #tpu.dot_dimension_numbers<[1], [0], [0], [1], [0, 0, 1, 1], [], []>} : vector<8x32xbf16>, vector<32x8xbf16>, vector<8x8xf32> -> vector<8x8xf32>
    %c0_6 = arith.constant 0 : index
    %c0_7 = arith.constant 0 : index
    %c0_8 = arith.constant 0 : index
    %9 = vector.load %arg5[%c0_6, %c0_7, %c0_8] : memref<1x1x8xf32, #tpu.memory_space<vmem>>, vector<1x1x8xf32>
    %10 = vector.shape_cast %9 : vector<1x1x8xf32> to vector<1x8xf32>
    %11 = vector.broadcast %10 : vector<1x8xf32> to vector<8x8xf32>
    %12 = arith.addf %8, %11 : vector<8x8xf32>
    %c0_9 = arith.constant 0 : index
    %c0_10 = arith.constant 0 : index
    %c0_11 = arith.constant 0 : index
    %13 = vector.load %arg6[%c0_9, %c0_10, %c0_11] : memref<1x32x8xbf16, #tpu.memory_space<vmem>>, vector<1x32x8xbf16>
    %14 = vector.shape_cast %13 : vector<1x32x8xbf16> to vector<32x8xbf16>
    %cst_12 = arith.constant dense<0.000000e+00> : vector<8x8xf32>
    %15 = tpu.matmul %2, %14, %cst_12 {dimension_numbers = #tpu.dot_dimension_numbers<[1], [0], [0], [1], [0, 0, 1, 1], [], []>} : vector<8x32xbf16>, vector<32x8xbf16>, vector<8x8xf32> -> vector<8x8xf32>
    %c0_13 = arith.constant 0 : index
    %c0_14 = arith.constant 0 : index
    %c0_15 = arith.constant 0 : index
    %16 = vector.load %arg7[%c0_13, %c0_14, %c0_15] : memref<1x1x8xf32, #tpu.memory_space<vmem>>, vector<1x1x8xf32>
    %17 = vector.shape_cast %16 : vector<1x1x8xf32> to vector<1x8xf32>
    %18 = vector.broadcast %17 : vector<1x8xf32> to vector<8x8xf32>
    %19 = arith.addf %15, %18 : vector<8x8xf32>
    %c0_16 = arith.constant 0 : index
    %c0_17 = arith.constant 0 : index
    %c0_18 = arith.constant 0 : index
    %20 = vector.load %arg8[%c0_16, %c0_17, %c0_18] : memref<1x32x8xbf16, #tpu.memory_space<vmem>>, vector<1x32x8xbf16>
    %21 = vector.shape_cast %20 : vector<1x32x8xbf16> to vector<32x8xbf16>
    %cst_19 = arith.constant dense<0.000000e+00> : vector<8x8xf32>
    %22 = tpu.matmul %2, %21, %cst_19 {dimension_numbers = #tpu.dot_dimension_numbers<[1], [0], [0], [1], [0, 0, 1, 1], [], []>} : vector<8x32xbf16>, vector<32x8xbf16>, vector<8x8xf32> -> vector<8x8xf32>
    %c0_20 = arith.constant 0 : index
    %c0_21 = arith.constant 0 : index
    %c0_22 = arith.constant 0 : index
    %23 = vector.load %arg9[%c0_20, %c0_21, %c0_22] : memref<1x1x8xf32, #tpu.memory_space<vmem>>, vector<1x1x8xf32>
    %24 = vector.shape_cast %23 : vector<1x1x8xf32> to vector<1x8xf32>
    %25 = vector.broadcast %24 : vector<1x8xf32> to vector<8x8xf32>
    %26 = arith.addf %22, %25 : vector<8x8xf32>
    %27 = arith.truncf %12 : vector<8x8xf32> to vector<8x8xbf16>
    %28 = arith.truncf %19 : vector<8x8xf32> to vector<8x8xbf16>
    %cst_23 = arith.constant dense<0.000000e+00> : vector<8x8xf32>
    %29 = tpu.matmul %27, %28, %cst_23 {dimension_numbers = #tpu.dot_dimension_numbers<[1], [1], [0], [0], [0, 0, 1, 0], [], []>} : vector<8x8xbf16>, vector<8x8xbf16>, vector<8x8xf32> -> vector<8x8xf32>
    %c0_24 = arith.constant 0 : index
    %c0_25 = arith.constant 0 : index
    %30 = vector.load %arg20[%c0_24, %c0_25] : memref<8x8xf32, #tpu.memory_space<vmem>>, vector<8x8xf32>
    %31 = arith.addf %29, %30 : vector<8x8xf32>
    %cst_26 = arith.constant dense<0xFF800000> : vector<8xf32>
    %32 = vector.multi_reduction <maximumf>, %31, %cst_26 [1] : vector<8x8xf32> to vector<8xf32>
    %33 = vector.shape_cast %32 : vector<8xf32> to vector<8x1xf32>
    %34 = vector.broadcast %33 : vector<8x1xf32> to vector<8x8xf32>
    %35 = arith.subf %31, %34 : vector<8x8xf32>
    %36 = math.exp %35 : vector<8x8xf32>
    %cst_27 = arith.constant dense<0.000000e+00> : vector<8xf32>
    %37 = vector.multi_reduction <add>, %36, %cst_27 [1] : vector<8x8xf32> to vector<8xf32>
    %38 = vector.shape_cast %37 : vector<8xf32> to vector<8x1xf32>
    %39 = tpu.reciprocal %38 {approx = true} : vector<8x1xf32> -> vector<8x1xf32>
    %40 = vector.broadcast %39 : vector<8x1xf32> to vector<8x8xf32>
    %41 = arith.mulf %36, %40 : vector<8x8xf32>
    %42 = arith.truncf %41 : vector<8x8xf32> to vector<8x8xbf16>
    %43 = arith.truncf %26 : vector<8x8xf32> to vector<8x8xbf16>
    %cst_28 = arith.constant dense<0.000000e+00> : vector<8x8xf32>
    %44 = tpu.matmul %42, %43, %cst_28 {dimension_numbers = #tpu.dot_dimension_numbers<[1], [0], [0], [1], [0, 0, 1, 1], [], []>} : vector<8x8xbf16>, vector<8x8xbf16>, vector<8x8xf32> -> vector<8x8xf32>
    %c0_29 = arith.constant 0 : index
    %c0_30 = arith.constant 0 : index
    %45 = vector.load %arg19[%c0_29, %c0_30] : memref<8x32xf32, #tpu.memory_space<vmem>>, vector<8x32xf32>
    %46 = arith.truncf %44 : vector<8x8xf32> to vector<8x8xbf16>
    %c0_31 = arith.constant 0 : index
    %c0_32 = arith.constant 0 : index
    %c0_33 = arith.constant 0 : index
    %47 = vector.load %arg10[%c0_31, %c0_32, %c0_33] : memref<1x8x32xbf16, #tpu.memory_space<vmem>>, vector<1x8x32xbf16>
    %48 = vector.shape_cast %47 : vector<1x8x32xbf16> to vector<8x32xbf16>
    %cst_34 = arith.constant dense<0.000000e+00> : vector<8x32xf32>
    %49 = tpu.matmul %46, %48, %cst_34 {dimension_numbers = #tpu.dot_dimension_numbers<[1], [0], [0], [1], [0, 0, 1, 1], [], []>} : vector<8x8xbf16>, vector<8x32xbf16>, vector<8x32xf32> -> vector<8x32xf32>
    %50 = arith.addf %45, %49 : vector<8x32xf32>
    %c0_35 = arith.constant 0 : index
    %c0_36 = arith.constant 0 : index
    %51 = vector.load %arg19[%c0_35, %c0_36] : memref<8x32xf32, #tpu.memory_space<vmem>>, vector<8x32xf32>
    tpu.vector_store %arg19[%c0_35, %c0_36], %50 {strides = array<i32>} : memref<8x32xf32, #tpu.memory_space<vmem>>, vector<8x32xf32>,
    %c3_i32 = arith.constant 3 : i32
    %52 = arith.cmpi eq, %arg1, %c3_i32 : i32
    %53 = arith.extui %52 : i1 to i32
    %c0_i32_37 = arith.constant 0 : i32
    %54 = arith.cmpi ne, %53, %c0_i32_37 : i32
    scf.if %54 {
      %c0_38 = arith.constant 0 : index
      %c0_39 = arith.constant 0 : index
      %55 = vector.load %arg12[%c0_38, %c0_39] : memref<1x32xf32, #tpu.memory_space<vmem>>, vector<1x32xf32>
      %c0_40 = arith.constant 0 : index
      %c0_41 = arith.constant 0 : index
      %56 = vector.load %arg13[%c0_40, %c0_41] : memref<1x32xf32, #tpu.memory_space<vmem>>, vector<1x32xf32>
      %c0_42 = arith.constant 0 : index
      %c0_43 = arith.constant 0 : index
      %57 = vector.load %arg19[%c0_42, %c0_43] : memref<8x32xf32, #tpu.memory_space<vmem>>, vector<8x32xf32>
      %c0_44 = arith.constant 0 : index
      %c0_45 = arith.constant 0 : index
      %58 = vector.load %arg11[%c0_44, %c0_45] : memref<1x32xf32, #tpu.memory_space<vmem>>, vector<1x32xf32>
      %59 = vector.broadcast %58 : vector<1x32xf32> to vector<8x32xf32>
      %60 = arith.addf %57, %59 : vector<8x32xf32>
      %61 = arith.addf %1, %60 : vector<8x32xf32>
      %cst_46 = arith.constant dense<0.000000e+00> : vector<8xf32>
      %62 = vector.multi_reduction <add>, %61, %cst_46 [1] : vector<8x32xf32> to vector<8xf32>
      %63 = vector.shape_cast %62 : vector<8xf32> to vector<8x1xf32>
      %cst_47 = arith.constant 3.200000e+01 : f32
      %64 = vector.broadcast %cst_47 : f32 to vector<8x1xf32>
      %65 = arith.divf %63, %64 : vector<8x1xf32>
      %66 = vector.broadcast %65 : vector<8x1xf32> to vector<8x32xf32>
      %67 = arith.subf %61, %66 : vector<8x32xf32>
      %68 = arith.mulf %67, %67 : vector<8x32xf32>
      %cst_48 = arith.constant dense<0.000000e+00> : vector<8xf32>
      %69 = vector.multi_reduction <add>, %68, %cst_48 [1] : vector<8x32xf32> to vector<8xf32>
      %70 = vector.shape_cast %69 : vector<8xf32> to vector<8x1xf32>
      %cst_49 = arith.constant 3.200000e+01 : f32
      %71 = vector.broadcast %cst_49 : f32 to vector<8x1xf32>
      %72 = arith.divf %70, %71 : vector<8x1xf32>
      %cst_50 = arith.constant 9.99999974E-6 : f32
      %73 = vector.broadcast %cst_50 : f32 to vector<8x1xf32>
      %74 = arith.addf %72, %73 : vector<8x1xf32>
      %75 = math.rsqrt %74 : vector<8x1xf32>
      %76 = vector.broadcast %75 : vector<8x1xf32> to vector<8x32xf32>
      %77 = arith.mulf %67, %76 : vector<8x32xf32>
      %78 = vector.broadcast %55 : vector<1x32xf32> to vector<8x32xf32>
      %79 = arith.mulf %77, %78 : vector<8x32xf32>
      %80 = vector.broadcast %56 : vector<1x32xf32> to vector<8x32xf32>
      %81 = arith.addf %79, %80 : vector<8x32xf32>
      %82 = arith.truncf %81 : vector<8x32xf32> to vector<8x32xbf16>
      %c0_51 = arith.constant 0 : index
      %c0_52 = arith.constant 0 : index
      %83 = vector.load %arg14[%c0_51, %c0_52] : memref<32x64xbf16, #tpu.memory_space<vmem>>, vector<32x64xbf16>
      %cst_53 = arith.constant dense<0.000000e+00> : vector<8x64xf32>
      %84 = tpu.matmul %82, %83, %cst_53 {dimension_numbers = #tpu.dot_dimension_numbers<[1], [0], [0], [1], [0, 0, 1, 1], [], []>} : vector<8x32xbf16>, vector<32x64xbf16>, vector<8x64xf32> -> vector<8x64xf32>
      %c0_54 = arith.constant 0 : index
      %c0_55 = arith.constant 0 : index
      %85 = vector.load %arg15[%c0_54, %c0_55] : memref<1x64xf32, #tpu.memory_space<vmem>>, vector<1x64xf32>
      %86 = vector.broadcast %85 : vector<1x64xf32> to vector<8x64xf32>
      %87 = arith.addf %84, %86 : vector<8x64xf32>
      %cst_56 = arith.constant 0.000000e+00 : f32
      %88 = vector.broadcast %cst_56 : f32 to vector<8x64xf32>
      %89 = arith.maximumf %87, %88 : vector<8x64xf32>
      %90 = arith.truncf %89 : vector<8x64xf32> to vector<8x64xbf16>
      %c0_57 = arith.constant 0 : index
      %c0_58 = arith.constant 0 : index
      %91 = vector.load %arg16[%c0_57, %c0_58] : memref<64x32xbf16, #tpu.memory_space<vmem>>, vector<64x32xbf16>
      %cst_59 = arith.constant dense<0.000000e+00> : vector<8x32xf32>
      %92 = tpu.matmul %90, %91, %cst_59 {dimension_numbers = #tpu.dot_dimension_numbers<[1], [0], [0], [1], [0, 0, 1, 1], [], []>} : vector<8x64xbf16>, vector<64x32xbf16>, vector<8x32xf32> -> vector<8x32xf32>
      %c0_60 = arith.constant 0 : index
      %c0_61 = arith.constant 0 : index
      %93 = vector.load %arg17[%c0_60, %c0_61] : memref<1x32xf32, #tpu.memory_space<vmem>>, vector<1x32xf32>
      %94 = vector.broadcast %93 : vector<1x32xf32> to vector<8x32xf32>
      %95 = arith.addf %92, %94 : vector<8x32xf32>
      %96 = arith.addf %81, %95 : vector<8x32xf32>
      %cst_62 = arith.constant dense<0.000000e+00> : vector<8xf32>
      %97 = vector.multi_reduction <add>, %96, %cst_62 [1] : vector<8x32xf32> to vector<8xf32>
      %98 = vector.shape_cast %97 : vector<8xf32> to vector<8x1xf32>
      %cst_63 = arith.constant 3.200000e+01 : f32
      %99 = vector.broadcast %cst_63 : f32 to vector<8x1xf32>
      %100 = arith.divf %98, %99 : vector<8x1xf32>
      %101 = vector.broadcast %100 : vector<8x1xf32> to vector<8x32xf32>
      %102 = arith.subf %96, %101 : vector<8x32xf32>
      %103 = arith.mulf %102, %102 : vector<8x32xf32>
      %cst_64 = arith.constant dense<0.000000e+00> : vector<8xf32>
      %104 = vector.multi_reduction <add>, %103, %cst_64 [1] : vector<8x32xf32> to vector<8xf32>
      %105 = vector.shape_cast %104 : vector<8xf32> to vector<8x1xf32>
      %cst_65 = arith.constant 3.200000e+01 : f32
      %106 = vector.broadcast %cst_65 : f32 to vector<8x1xf32>
      %107 = arith.divf %105, %106 : vector<8x1xf32>
      %cst_66 = arith.constant 9.99999974E-6 : f32
      %108 = vector.broadcast %cst_66 : f32 to vector<8x1xf32>
      %109 = arith.addf %107, %108 : vector<8x1xf32>
      %110 = math.rsqrt %109 : vector<8x1xf32>
      %111 = vector.broadcast %110 : vector<8x1xf32> to vector<8x32xf32>
      %112 = arith.mulf %102, %111 : vector<8x32xf32>
      %113 = vector.broadcast %55 : vector<1x32xf32> to vector<8x32xf32>
      %114 = arith.mulf %112, %113 : vector<8x32xf32>
      %115 = vector.broadcast %56 : vector<1x32xf32> to vector<8x32xf32>
      %116 = arith.addf %114, %115 : vector<8x32xf32>
      %c0_67 = arith.constant 0 : index
      %c0_68 = arith.constant 0 : index
      %c0_69 = arith.constant 0 : index
      %117 = vector.load %arg18[%c0_67, %c0_68, %c0_69] : memref<1x8x32xf32, #tpu.memory_space<vmem>>, vector<1x8x32xf32>
      %118 = vector.shape_cast %117 : vector<1x8x32xf32> to vector<8x32xf32>
      %119 = vector.shape_cast %116 : vector<8x32xf32> to vector<1x8x32xf32>
      tpu.vector_store %arg18[%c0_67, %c0_68, %c0_69], %119 {strides = array<i32>} : memref<1x8x32xf32, #tpu.memory_space<vmem>>, vector<1x8x32xf32>,
    } else {
    }
    return
  }
  func.func @transform_0(%arg0: i32, %arg1: i32) -> (i32, i32, i32) {
    %c0_i32 = arith.constant 0 : i32
    %c0_i32_0 = arith.constant 0 : i32
    %c0_i32_1 = arith.constant 0 : i32
    return %arg0, %c0_i32, %c0_i32_0 : i32, i32, i32
  }
  func.func @transform_1(%arg0: i32, %arg1: i32) -> (i32, i32, i32) {
    %c0_i32 = arith.constant 0 : i32
    %c0_i32_0 = arith.constant 0 : i32
    %c0_i32_1 = arith.constant 0 : i32
    return %arg0, %c0_i32, %c0_i32_0 : i32, i32, i32
  }
  func.func @transform_2(%arg0: i32, %arg1: i32) -> (i32, i32, i32) {
    %c0_i32 = arith.constant 0 : i32
    %c0_i32_0 = arith.constant 0 : i32
    %c0_i32_1 = arith.constant 0 : i32
    return %arg1, %c0_i32, %c0_i32_0 : i32, i32, i32
  }
  func.func @transform_3(%arg0: i32, %arg1: i32) -> (i32, i32, i32) {
    %c0_i32 = arith.constant 0 : i32
    %c0_i32_0 = arith.constant 0 : i32
    %c0_i32_1 = arith.constant 0 : i32
    return %arg1, %c0_i32, %c0_i32_0 : i32, i32, i32
  }
  func.func @transform_4(%arg0: i32, %arg1: i32) -> (i32, i32, i32) {
    %c0_i32 = arith.constant 0 : i32
    %c0_i32_0 = arith.constant 0 : i32
    %c0_i32_1 = arith.constant 0 : i32
    return %arg1, %c0_i32, %c0_i32_0 : i32, i32, i32
  }
  func.func @transform_5(%arg0: i32, %arg1: i32) -> (i32, i32, i32) {
    %c0_i32 = arith.constant 0 : i32
    %c0_i32_0 = arith.constant 0 : i32
    %c0_i32_1 = arith.constant 0 : i32
    return %arg1, %c0_i32, %c0_i32_0 : i32, i32, i32
  }
  func.func @transform_6(%arg0: i32, %arg1: i32) -> (i32, i32, i32) {
    %c0_i32 = arith.constant 0 : i32
    %c0_i32_0 = arith.constant 0 : i32
    %c0_i32_1 = arith.constant 0 : i32
    return %arg1, %c0_i32, %c0_i32_0 : i32, i32, i32
  }
  func.func @transform_7(%arg0: i32, %arg1: i32) -> (i32, i32, i32) {
    %c0_i32 = arith.constant 0 : i32
    %c0_i32_0 = arith.constant 0 : i32
    %c0_i32_1 = arith.constant 0 : i32
    return %arg1, %c0_i32, %c0_i32_0 : i32, i32, i32
  }
  func.func @transform_8(%arg0: i32, %arg1: i32) -> (i32, i32, i32) {
    %c0_i32 = arith.constant 0 : i32
    %c0_i32_0 = arith.constant 0 : i32
    %c0_i32_1 = arith.constant 0 : i32
    return %arg1, %c0_i32, %c0_i32_0 : i32, i32, i32
  }
  func.func @transform_9(%arg0: i32, %arg1: i32) -> (i32, i32) {
    %c0_i32 = arith.constant 0 : i32
    %c0_i32_0 = arith.constant 0 : i32
    %c0_i32_1 = arith.constant 0 : i32
    return %c0_i32, %c0_i32_0 : i32, i32
  }
  func.func @transform_10(%arg0: i32, %arg1: i32) -> (i32, i32) {
    %c0_i32 = arith.constant 0 : i32
    %c0_i32_0 = arith.constant 0 : i32
    %c0_i32_1 = arith.constant 0 : i32
    return %c0_i32, %c0_i32_0 : i32, i32
  }
  func.func @transform_11(%arg0: i32, %arg1: i32) -> (i32, i32) {
    %c0_i32 = arith.constant 0 : i32
    %c0_i32_0 = arith.constant 0 : i32
    %c0_i32_1 = arith.constant 0 : i32
    return %c0_i32, %c0_i32_0 : i32, i32
  }
  func.func @transform_12(%arg0: i32, %arg1: i32) -> (i32, i32) {
    %c0_i32 = arith.constant 0 : i32
    %c0_i32_0 = arith.constant 0 : i32
    %c0_i32_1 = arith.constant 0 : i32
    return %c0_i32, %c0_i32_0 : i32, i32
  }
  func.func @transform_13(%arg0: i32, %arg1: i32) -> (i32, i32) {
    %c0_i32 = arith.constant 0 : i32
    %c0_i32_0 = arith.constant 0 : i32
    %c0_i32_1 = arith.constant 0 : i32
    return %c0_i32, %c0_i32_0 : i32, i32
  }
  func.func @transform_14(%arg0: i32, %arg1: i32) -> (i32, i32) {
    %c0_i32 = arith.constant 0 : i32
    %c0_i32_0 = arith.constant 0 : i32
    %c0_i32_1 = arith.constant 0 : i32
    return %c0_i32, %c0_i32_0 : i32, i32
  }
  func.func @transform_15(%arg0: i32, %arg1: i32) -> (i32, i32) {
    %c0_i32 = arith.constant 0 : i32
    %c0_i32_0 = arith.constant 0 : i32
    %c0_i32_1 = arith.constant 0 : i32
    return %c0_i32, %c0_i32_0 : i32, i32
  }
  func.func @transform_16(%arg0: i32, %arg1: i32) -> (i32, i32, i32) {
    %c0_i32 = arith.constant 0 : i32
    %c0_i32_0 = arith.constant 0 : i32
    %c0_i32_1 = arith.constant 0 : i32
    return %arg0, %c0_i32, %c0_i32_0 : i32, i32, i32
  }
}

</mosaic_0001>

<bundles_post_ra>
// kernel: _lambda_.1
= control target key start
LH: loop header
LB: loop body
LE: loop exit
PB: predicated region body
PF: predicated region fallthrough
CT: control target
= control target key end

     0   :  { %s2725_s0 = inlined_call_operand.vmem [shape: f32[2,8,32], index: 0, kind: input, shape index: {}]   ;;  %s2726_s1 = inlined_call_operand.vmem [shape: s8[2,8,8], index: 1, kind: input, shape index: {}]   ;;  %s2727_s2 = inlined_call_operand.hbm [shape: bf16[4,32,8], index: 2, kind: input, shape index: {}]   ;;  %s2728_s3 = inlined_call_operand.vmem [shape: f32[4,1,8], index: 3, kind: input, shape index: {}, may-alias: {3,5,7}]   ;;  %s2729_s4 = inlined_call_operand.hbm [shape: bf16[4,32,8], index: 4, kind: input, shape index: {}]   ;;  %s2730_s5 = inlined_call_operand.vmem [shape: f32[4,1,8], index: 5, kind: input, shape index: {}, may-alias: {3,5,7}]   ;;  %s2731_s6 = inlined_call_operand.vmem [shape: bf16[4,32,8], index: 6, kind: input, shape index: {}]   ;;  %s2732_s7 = inlined_call_operand.vmem [shape: f32[4,1,8], index: 7, kind: input, shape index: {}, may-alias: {3,5,7}]   ;;  %s2733_s8 = inlined_call_operand.hbm [shape: bf16[4,8,32], index: 8, kind: input, shape index: {}]   ;;  %s2734_s9 = inlined_call_operand.vmem [shape: f32[1,32], index: 9, kind: input, shape index: {}, may-alias: {9,11,15}]   ;;  %s2735_s10 = inlined_call_operand.vmem [shape: f32[1,32], index: 10, kind: input, shape index: {}]   ;;  %s2736_s11 = inlined_call_operand.vmem [shape: f32[1,32], index: 11, kind: input, shape index: {}, may-alias: {9,11,15}]   ;;  %s2737_s12 = inlined_call_operand.hbm [shape: bf16[32,64], index: 12, kind: input, shape index: {}]   ;;  %s2738_s13 = inlined_call_operand.vmem [shape: f32[1,64], index: 13, kind: input, shape index: {}]   ;;  %s2739_s14 = inlined_call_operand.hbm [shape: bf16[64,32], index: 14, kind: input, shape index: {}]   ;;  %s2740_s15 = inlined_call_operand.vmem [shape: f32[1,32], index: 15, kind: input, shape index: {}, may-alias: {9,11,15}]   ;;  %s2741_s16 = inlined_call_operand.hbm [shape: f32[2,8,32], index: 16, kind: output, shape index: {}]  }
   0x1   :  { %2770 = sst [smem:[#allocation28_spill]] %s2725_s0 }
   0x2   :  { %2771 = sst [smem:[#allocation29_spill]] %s2726_s1 }
   0x3   :  { %2772 = sst [smem:[#allocation30_spill]] %s2727_s2 }
   0x4   :  { %2773 = sst [smem:[#allocation31_spill]] %s2728_s3 }
   0x5   :  { %2774 = sst [smem:[#allocation32_spill]] %s2729_s4 }
   0x6   :  { %2775 = sst [smem:[#allocation33_spill]] %s2730_s5 }
   0x7   :  { %2776 = sst [smem:[#allocation34_spill]] %s2731_s6 }
   0x8   :  { %2777 = sst [smem:[#allocation35_spill]] %s2732_s7 }
   0x9   :  { %2778 = sst [smem:[#allocation36_spill]] %s2733_s8 }
   0xa   :  { %2779 = sst [smem:[#allocation37_spill]] %s2734_s9 }
   0xb   :  { %2780 = sst [smem:[#allocation38_spill]] %s2735_s10 }
   0xc   :  { %2781 = sst [smem:[#allocation39_spill]] %s2736_s11 }
   0xd   :  { %2782 = sst [smem:[#allocation40_spill]] %s2737_s12 }
   0xe   :  { %2783 = sst [smem:[#allocation41_spill]] %s2738_s13 }
   0xf   :  { %2784 = sst [smem:[#allocation42_spill]] %s2739_s14 }
  0x10   :  { %2785 = sst [smem:[#allocation43_spill]] %s2740_s15 }
  0x11   :  { %2786 = sst [smem:[#allocation44_spill]] %s2741_s16 }
  0x12   :  { %21 = vsyncpa [#allocation5], 0 }
  0x13   :  { %23 = vsyncpa [#allocation5 + $0x1], 0 }
  0x14   :  { %24 = vsyncpa [#allocation8], 0 }
  0x15   :  { %26 = vsyncpa [#allocation8 + $0x1], 0 }
  0x16   :  { %27 = vsyncpa [#allocation11], 0 }
  0x17   :  { %28 = vsyncpa [#allocation6], 0 }
  0x18   :  { %30 = vsyncpa [#allocation6 + $0x1], 0  ;;  %s2238_s21 = smov 0   ;;  %s2240_s22 = smov 0  }
  0x19   :  { %s2242_s23 = smov 0   ;;  %s2244_s24 = smov 0  }
  0x1a   :  { %s2246_s25 = smov 0   ;;  %s2248_s26 = smov 0  }
  0x1b   :  { %s2250_s27 = smov 0   ;;  %s2252_s28 = smov 0  }
  0x1c   :  { %s2254_s29 = smov 0   ;;  %s2256_s30 = smov 0  }
  0x1d   :  { %s2258_s0 = smov 0  }
  0x1e LB: > { %2787 = sst [smem:[#allocation18_spill]] %s2097_s21  ;;  %s2292_s17 = sadd.s32 4294967295, %s2137_s0   ;;  %s2137_s0 = sphi %s2258_s0, %s36_s0   ;;  %s2133_s30 = sphi %s2256_s30, %s2856_s30   ;;  %s2129_s29 = sphi %s2254_s29, %s2855_s29   ;;  %s2125_s28 = sphi %s2252_s28, %s2854_s28   ;;  %s2121_s27 = sphi %s2250_s27, %s2853_s27   ;;  %s2117_s26 = sphi %s2248_s26, %s2852_s26   ;;  %s2113_s25 = sphi %s2246_s25, %s2861_s25   ;;  %s2109_s24 = sphi %s2244_s24, %s2860_s24   ;;  %s2105_s23 = sphi %s2242_s23, %s2859_s23   ;;  %s2101_s22 = sphi %s2240_s22, %s2858_s22   ;;  %s2097_s21 = sphi %s2238_s21, %s2857_s21  }
  0x1f   : > { %2788 = sst [smem:[#allocation19_spill]] %s2117_s26  ;;  %s1554_s18 = sadd.s32 4294967294, %s2137_s0  }
  0x20   : > { %2789 = sst [smem:[#allocation20_spill]] %s2121_s27  ;;  %p114_p0 = scmp.ne.s32.totalorder %s2117_s26, %s2113_s25 }
  0x21   : > { %2790 = sst [smem:[#allocation21_spill]] %s2129_s29  ;;  %p115_p1 = scmp.eq.s32.totalorder %s2137_s0, 0 }
  0x22   : > { %2791 = sst [smem:[#allocation22_spill]] %s2133_s30  ;;  %p120_p2 = scmp.ne.s32.totalorder %s2113_s25, %s2109_s24 }
  0x23   : > { %p2747_p3 = scmp.eq.s32.totalorder %s2292_s17, 0  ;;  %p2302_p4 = por %p115_p1, %p114_p0 }
  0x24   : > { %p446_p5 = scmp.ne.s32.totalorder %s2105_s23, %s2101_s22  ;;  %p447_p7 = scmp.eq.s32.totalorder %s2292_s17, 7 }
  0x25   : > { %s2792_s16 = scalar_select %p2302_p4, 1, 0 }
  0x26   : > { %p2310_p6 = por %p2747_p3, %p120_p2  ;;  %p452_p8 = scmp.ne.s32.totalorder %s2101_s22, %s2097_s21 }
  0x27   : > { %p453_p9 = scmp.eq.s32.totalorder %s1554_s18, 7  ;;  %p2317_p10 = por %p447_p7, %p446_p5 }
  0x28   : > { %s2793_s15 = scalar_select %p2310_p6, 1, 0 }
  0x29   : > { %s2794_s19 = scalar_select %p2317_p10, 1, 0 }
  0x2a   : > { %p1555_p11 = scmp.ge.s32.totalorder %s2137_s0, 1  ;;  %p2322_p12 = por %p453_p9, %p452_p8 }
  0x2b   : > { %2795 = sst [smem:[#allocation23_spill]] %s2794_s19  ;;  %p460_p13 = scmp.lt.s32.totalorder %s2137_s0, 9 }
  0x2c   : > { %s2796_s24 = scalar_select %p2322_p12, 1, 0 }
  0x2d   : > { %p2327_p0 = pnand %p1555_p11, %p460_p13  ;;  %s2139_s13 = smov [#allocation10]  }
  0x2e   : > { %2797 = sst [smem:[#allocation24_spill]] %s2796_s24  ;;  %s481_s11 = sshll.u32 %s2139_s13, 4  ;;  %s482_s11 = int_to_ptr.vmem [resolvable:$true] %s481_s11 }
  0x2f   : > { %s2798_s20 = scalar_select %p2327_p0, 1, 0 }
  0x30   : > { %p1716_p1 = pneg %p2327_p0  ;;  %s45_s21 = sadd.s32 1, %s2129_s29 }
  0x31   : > { %s2800_s12 = sld [smem:[#allocation40_spill]] }
  0x32   : > { %p2335_p2 = pnand %p1716_p1, %p2747_p3 }
  0x34   : > { %s2799_s18 = scalar_select %p2335_p2, 1, 0 }
  0x35   : > { %p2759_p7 = pneg %p2335_p2 }
  0x37   : > { %s1861_s10 = scalar_lea.hbm %s2800_s12, 256 }
  0x38   : > { %p1862_p5 = scmp.ne.s32.totalorder %s2800_s12, %s1861_s10  ;;  %p1868_p11 = scmp.lt.u32.totalorder %s1861_s10, %s2800_s12 }
  0x3a   : > { %p1864_p8 = pnand %p2759_p7, %p1862_p5 }
  0x3c   : > { %p1865_p9 = pneg %p1864_p8 }
  0x3e   : > { %p1870_p13 = pnand %p1868_p11, %p1865_p9 }
  0x40   : > { %1873 = shalt.err (!%p1870_p13)
}
  0x41   : > { %s1874_s5 = scalar_lea.vmem %s482_s11, 256  ;;  %p1882_p10 = scmp.lt.s32.totalorder %s482_s11, %s482_s11 }
  0x42   : > { %p1875_p1 = scmp.ne.s32.totalorder %s482_s11, %s1874_s5  ;;  %p1883_p6 = scmp.lt.s32.totalorder %s1874_s5, %s1874_s5 }
  0x44   : > { %p1877_p3 = pnand %p1875_p1, %p2759_p7  ;;  %p1884_p0 = por %p1883_p6, %p1882_p10 }
  0x46   : > { %p1878_p12 = pneg %p1877_p3 }
  0x48   : > { %p1885_p4 = pnand %p1884_p0, %p1878_p12 }
  0x4a   : > { %1888 = shalt.err (!%p1885_p4)
}
  0x4b   : > { %s2751_s6 = smov 64   ;;  %s2753_s7 = smov 4  }
  0x4c   : > { %1719 = dma.hbm_to_vmem [thread:$0]  (!%p2335_p2), %s2800_s12, 256, %s482_s11, [#allocation11], %s2751_s6, %s2751_s6, %s2753_s7  }
  0x4d   : > { %p46_p3 = scmp.ge.s32.totalorder %s45_s21, 4  ;;  %s48_s10 = sadd.s32 1, %s2133_s30 }
  0x4e   : > { %p1739_p4 = scmp.lt.s32.totalorder %s2137_s0, 8  ;;  %s2368_s19 = sand.u32 1, %s2117_s26  }
  0x4f   : > { %s2863_s21 = smov (%p46_p3, %s45_s21), 0  ;;  %s2865_s10 = smov (!%p46_p3, %s48_s10), %s2133_s30 }
  0x50   : > { %2801 = sst [smem:[#allocation25_spill]] %s2863_s21  ;;  %s104_s24 = ssub.s32 %s2129_s29, %s2863_s21 }
  0x51   : > { %p50_p6 = scmp.ge.s32.totalorder %s2865_s10, 2  ;;  %p105_p10 = scmp.eq.s32.totalorder %s104_s24, 0 }
  0x52   : > { %s2758_s11 = sshll.u32 %s2129_s29, 8  ;;  %p2802_p12 = scmp.ne.s32.totalorder %s2792_s16, 0 }
  0x53   : > { %s2867_s10 = smov (%p50_p6, %s2865_s10), 0  ;;  %s2805_s9 = sadd.s32 1, %s2117_s26 }
  0x54   : > { %p2379_p0 = pnand %p1739_p4, %p2802_p12  ;;  %2804 = sst [smem:[#allocation26_spill]] %s2867_s10 }
  0x55   : > { %s2388_s6 = scalar_select %p105_p10, %s2117_s26, %s2805_s9  }
  0x56   : > { %s2803_s5 = scalar_select %p2379_p0, 1, 0 }
  0x57   : > { %2806 = sst [smem:[#allocation27_spill]] %s2388_s6  ;;  %s433_s7 = ssub.s32 %s2133_s30, %s2867_s10 }
  0x58   : > { %p434_p5 = scmp.eq.s32.totalorder %s433_s7, 0  ;;  %s555_s12 = sand.u32 1, %s2137_s0  }
  0x59   : > { %s2807_s21 = sadd.s32 1, %s2105_s23  ;;  %s2808_s4 = sld [smem:[#allocation32_spill]] }
  0x5a   : > { %s2396_s13 = scalar_select %p434_p5, %s2105_s23, %s2807_s21  }
  0x5b   : > { %s2809_s1 = sshll.u32 %s2368_s19, 4  ;;  %s2409_s7 = scalar_lea.sflag [#allocation8], %s555_s12 }
  0x5c   : > { %s559_s27 = scalar_lea.vmem [#allocation7], %s2809_s1  ;;  %p2415_p9 = pneg %p2379_p0 }
  0x5d   : > { %s566_s9 = sshll.u32 %s559_s27, 4  ;;  %s2407_s9 = int_to_ptr.vmem [resolvable:$true] %s566_s9 }
  0x5e   : > { %s2810_s21 = scalar_select %p2415_p9, 1, 0 }
  0x5f   : > { %s2403_s3 = scalar_lea.hbm %s2808_s4, %s2758_s11  ;;  %s1894_s1 = scalar_lea.hbm %s2808_s4, 1024 }
  0x60   : > { %s1889_s10 = scalar_lea.hbm %s2403_s3, 256  ;;  %p1895_p1 = scmp.lt.u32.totalorder %s2403_s3, %s2808_s4 }
  0x61   : > { %p1890_p8 = scmp.ne.s32.totalorder %s2403_s3, %s1889_s10  ;;  %p1896_p3 = scmp.lt.u32.totalorder %s1894_s1, %s1889_s10 }
  0x62   : > { %p1898_p6 = scmp.lt.u32.totalorder %s1889_s10, %s2403_s3 }
  0x63   : > { %p1892_p11 = pnand %p2415_p9, %p1890_p8  ;;  %p1897_p4 = por %p1896_p3, %p1895_p1 }
  0x65   : > { %p1893_p13 = pneg %p1892_p11  ;;  %p1899_p10 = por %p1898_p6, %p1897_p4 }
  0x67   : > { %p1900_p12 = pnand %p1899_p10, %p1893_p13 }
  0x69   : > { %1903 = shalt.err (!%p1900_p12)
}
  0x6a   : > { %s1904_s12 = scalar_lea.vmem %s2407_s9, 256  ;;  %s2142_s24 = smov [#allocation7]  }
  0x6b   : > { %p1905_p5 = scmp.ne.s32.totalorder %s2407_s9, %s1904_s12  ;;  %s1909_s16 = sshll.u32 %s2142_s24, 4  ;;  %s1910_s16 = int_to_ptr.vmem [resolvable:$false] %s1909_s16 }
  0x6c   : > { %s1911_s11 = scalar_lea.vmem %s1910_s16, 512  ;;  %p1912_p7 = scmp.lt.s32.totalorder %s2407_s9, %s1910_s16 }
  0x6d   : > { %p1907_p8 = pnand %p1905_p5, %p2415_p9  ;;  %p1913_p2 = scmp.lt.s32.totalorder %s1911_s11, %s1904_s12 }
  0x6f   : > { %p1908_p11 = pneg %p1907_p8  ;;  %p1914_p1 = por %p1913_p2, %p1912_p7 }
  0x71   : > { %p1915_p3 = pnand %p1914_p1, %p1908_p11 }
  0x73   : > { %1918 = shalt.err (!%p1915_p3)
}
  0x74   : > { %s2811_s10 = smov 4   ;;  %s2812_s1 = smov 64  }
  0x75   : > { %1729 = dma.hbm_to_vmem [thread:$0]  (!%p2379_p0), %s2403_s3, 256, %s2407_s9, %s2409_s7, %s2812_s1, %s2812_s1, %s2811_s10  }
  0x76   : > { %s2143_s27 = smov [#allocation12]   ;;  %s2813_s14 = sld [smem:[#allocation42_spill]] }
  0x77   : > { %s497_s4 = sshll.u32 %s2143_s27, 4  ;;  %p2814_p7 = scmp.ne.s32.totalorder %s2799_s18, 0  ;;  %s498_s4 = int_to_ptr.vmem [resolvable:$true] %s497_s4 }
  0x79   : > { %p2815_p13 = pneg %p2814_p7 }
  0x7c   : > { %s1919_s12 = scalar_lea.hbm %s2813_s14, 512 }
  0x7d   : > { %p1920_p2 = scmp.ne.s32.totalorder %s2813_s14, %s1919_s12  ;;  %p1926_p10 = scmp.lt.u32.totalorder %s1919_s12, %s2813_s14 }
  0x7f   : > { %p1922_p4 = pnand %p1920_p2, %p2815_p13 }
  0x81   : > { %p1923_p6 = pneg %p1922_p4 }
  0x83   : > { %p1928_p12 = pnand %p1926_p10, %p1923_p6 }
  0x85   : > { %1931 = shalt.err (!%p1928_p12)
}
  0x86   : > { %s1932_s3 = scalar_lea.vmem %s498_s4, 512  ;;  %p2816_p8 = pmov %p2815_p13 }
  0x87   : > { %p1933_p5 = scmp.ne.s32.totalorder %s498_s4, %s1932_s3  ;;  %p1940_p3 = scmp.lt.s32.totalorder %s498_s4, %s498_s4 }
  0x88   : > { %p1941_p0 = scmp.lt.s32.totalorder %s1932_s3, %s1932_s3 }
  0x89   : > { %p1935_p11 = pnand %p1933_p5, %p2816_p8 }
  0x8a   : > { %p1942_p9 = por %p1941_p0, %p1940_p3 }
  0x8b   : > { %p1936_p1 = pneg %p1935_p11 }
  0x8d   : > { %p1943_p2 = pnand %p1942_p9, %p1936_p1 }
  0x8f   : > { %1946 = shalt.err (!%p1943_p2)
}
  0x90   : > { %1722 = dma.hbm_to_vmem [thread:$0]  (!%p2814_p7), %s2813_s14, 512, %s498_s4, [#allocation11], %s2812_s1, %s2812_s1, %s2811_s10  }
  0x91   : > { %s2817_s6 = sshll.u32 %s2129_s29, 8  ;;  %s2818_s2 = sld [smem:[#allocation30_spill]] }
  0x92   : > { %s2819_s12 = sshll.u32 %s2368_s19, 4  ;;  %s1565_s11 = sshll.u32 %s2368_s19, 2 }
  0x93   : > { %s532_s18 = scalar_lea.vmem [#allocation4], %s2819_s12  ;;  %s529_s3 = scalar_lea.sflag [#allocation5], %s2368_s19 }
  0x94   : > { %s539_s16 = sshll.u32 %s532_s18, 4  ;;  %p2820_p9 = scmp.ne.s32.totalorder %s2810_s21, 0  ;;  %s2474_s16 = int_to_ptr.vmem [resolvable:$true] %s539_s16 }
  0x97   : > { %s2470_s24 = scalar_lea.hbm %s2818_s2, %s2817_s6  ;;  %s1952_s6 = scalar_lea.hbm %s2818_s2, 1024 }
  0x98   : > { %s1947_s26 = scalar_lea.hbm %s2470_s24, 256  ;;  %p1953_p4 = scmp.lt.u32.totalorder %s2470_s24, %s2818_s2 }
  0x99   : > { %p1948_p0 = scmp.ne.s32.totalorder %s2470_s24, %s1947_s26  ;;  %p1954_p6 = scmp.lt.u32.totalorder %s1952_s6, %s1947_s26 }
  0x9a   : > { %p1956_p12 = scmp.lt.u32.totalorder %s1947_s26, %s2470_s24 }
  0x9b   : > { %p1950_p7 = pnand %p1948_p0, %p2820_p9  ;;  %p1955_p10 = por %p1954_p6, %p1953_p4 }
  0x9d   : > { %p1951_p13 = pneg %p1950_p7  ;;  %p1957_p5 = por %p1956_p12, %p1955_p10 }
  0x9f   : > { %p1958_p8 = pnand %p1957_p5, %p1951_p13 }
  0xa1   : > { %1961 = shalt.err (!%p1958_p8)
}
  0xa2   : > { %s1962_s12 = scalar_lea.vmem %s2474_s16, 256  ;;  %s2144_s18 = smov [#allocation4]  }
  0xa3   : > { %p1963_p11 = scmp.ne.s32.totalorder %s2474_s16, %s1962_s12  ;;  %s1967_s4 = sshll.u32 %s2144_s18, 4  ;;  %s1968_s4 = int_to_ptr.vmem [resolvable:$false] %s1967_s4 }
  0xa4   : > { %s1969_s30 = scalar_lea.vmem %s1968_s4, 512  ;;  %p1970_p2 = scmp.lt.s32.totalorder %s2474_s16, %s1968_s4 }
  0xa5   : > { %p1965_p1 = pnand %p1963_p11, %p2820_p9  ;;  %p1971_p0 = scmp.lt.s32.totalorder %s1969_s30, %s1962_s12 }
  0xa7   : > { %p1966_p3 = pneg %p1965_p1  ;;  %p1972_p7 = por %p1971_p0, %p1970_p2 }
  0xa9   : > { %p1973_p4 = pnand %p1972_p7, %p1966_p3 }
  0xab   : > { %1976 = shalt.err (!%p1973_p4)
}
  0xac   : > { %p2821_p13 = scmp.ne.s32.totalorder %s2803_s5, 0  ;;  %s1566_s26 = sshll.u32 %s2129_s29, 6 }
  0xad   : > { %s2822_s8 = sld [smem:[#allocation36_spill]]  ;;  %s600_s12 = scalar_lea.vmem [#allocation9], %s1565_s11 }
  0xae   : > { %1726 = dma.hbm_to_vmem [thread:$0]  (!%p2821_p13), %s2470_s24, 256, %s2474_s16, %s529_s3, %s2812_s1, %s2812_s1, %s2811_s10  }
  0xaf   : > { %s607_s18 = sshll.u32 %s600_s12, 4  ;;  %s608_s18 = int_to_ptr.vmem [resolvable:$true] %s607_s18 }
  0xb3   : > { %s2508_s27 = scalar_lea.hbm %s2822_s8, %s1566_s26  ;;  %s1982_s24 = scalar_lea.hbm %s2822_s8, 256 }
  0xb4   : > { %s1977_s4 = scalar_lea.hbm %s2508_s27, 64  ;;  %p1983_p5 = scmp.lt.u32.totalorder %s2508_s27, %s2822_s8 }
  0xb5   : > { %p1978_p6 = scmp.ne.s32.totalorder %s2508_s27, %s1977_s4  ;;  %p1984_p8 = scmp.lt.u32.totalorder %s1982_s24, %s1977_s4 }
  0xb6   : > { %p1986_p1 = scmp.lt.u32.totalorder %s1977_s4, %s2508_s27 }
  0xb7   : > { %p1980_p10 = pnand %p1978_p6, %p2820_p9  ;;  %p1985_p11 = por %p1984_p8, %p1983_p5 }
  0xb9   : > { %p1981_p12 = pneg %p1980_p10  ;;  %p1987_p3 = por %p1986_p1, %p1985_p11 }
  0xbb   : > { %p1988_p2 = pnand %p1987_p3, %p1981_p12 }
  0xbd   : > { %1991 = shalt.err (!%p1988_p2)
}
  0xbe   : > { %s1992_s19 = scalar_lea.vmem %s608_s18, 64  ;;  %s2145_s11 = smov [#allocation9]  }
  0xbf   : > { %p1993_p0 = scmp.ne.s32.totalorder %s608_s18, %s1992_s19  ;;  %s1997_s30 = sshll.u32 %s2145_s11, 4  ;;  %s1998_s30 = int_to_ptr.vmem [resolvable:$false] %s1997_s30 }
  0xc0   : > { %s1999_s26 = scalar_lea.vmem %s1998_s30, 128  ;;  %p2000_p6 = scmp.lt.s32.totalorder %s608_s18, %s1998_s30 }
  0xc1   : > { %p1995_p7 = pnand %p1993_p0, %p2820_p9  ;;  %p2001_p10 = scmp.lt.s32.totalorder %s1999_s26, %s1992_s19 }
  0xc3   : > { %p1996_p4 = pneg %p1995_p7  ;;  %p2002_p13 = por %p2001_p10, %p2000_p6 }
  0xc5   : > { %p2003_p5 = pnand %p2002_p13, %p1996_p4 }
  0xc7   : > { %2006 = shalt.err (!%p2003_p5)
}
  0xc8   : > { %p2823_p8 = scmp.ne.s32.totalorder %s2803_s5, 0  ;;  %p2824_p12 = scmp.ne.s32.totalorder %s2798_s20, 0 }
  0xc9   : > { %s618_s21 = sand.u32 (!%p2824_p12), 1, %s2113_s25   ;;  %p2825_p9 = scmp.ne.s32.totalorder (!%p2824_p12), %s2793_s15, 0 }
  0xca   : > { %1732 = dma.hbm_to_vmem [thread:$0]  (!%p2823_p8), %s2508_s27, 64, %s608_s18, %s2409_s7  }
  0xcb   : > { %616 = sbr.rel (%p2824_p12) target bundleno = 2529 (0x9e1), region = 84  ;;  %s1568_s6 = sshll.u32 (!%p2824_p12), %s618_s21, 4 }
  0xcc   : > { %s619_s9 = scalar_lea.sflag (!%p2824_p12), [#allocation5], %s618_s21  ;;  %s2533_s12 = scalar_lea.vmem (!%p2824_p12), [#allocation4], %s1568_s6 }
  0xd2   : > { %2080 = dma.done.wait (%p2825_p9), %s619_s9, 256  }
  0xd3   : > { %2082 = vsyncadd (%p2825_p9), %s619_s9, 4294967040  ;;  %s627_s5 = sand.u32 1, %s2292_s17   ;;  %s2540_s7 = scalar_lea.vmem [#allocation7], %s1568_s6 }
  0xd4   : > { %s628_s4 = scalar_lea.sflag [#allocation8], %s627_s5 }
  0xd5   : > { %2084 = dma.done.wait (%p2825_p9), %s628_s4, 320  }
  0xd6   : > { %2086 = vsyncadd (%p2825_p9), %s628_s4, 4294966976  ;;  %s1570_s20 = sshll.u32 %s618_s21, 2  ;;  %p2826_p13 = scmp.eq.s32.totalorder %s2292_s17, 0 }
  0xd7   : > { %s2546_s27 = scalar_lea.vmem [#allocation9], %s1570_s20 }
  0xd8   : > { %2088 = dma.done.wait (%p2826_p13), [#allocation11], 768   ;;  %p2827_p11 = pmov %p2826_p13 }
  0xd9   : > { %s2828_s18 = sld [smem:[#allocation20_spill]]  ;;  %p729_p1 = scmp.lt.s32.totalorder %s2125_s28, 1 }
  0xda   : > { %2090 = vsyncadd (%p2827_p11), [#allocation11], 4294966528  ;;  %s2768_s10 = sand.u32 1, %s2101_s22   ;;  %s2829_s17 = sld [smem:[#allocation28_spill]] }
  0xdb   : > { %s2556_s15 = sshll.u32 %s2768_s10, 3  ;;  %s2830_s21 = sld [smem:[#allocation29_spill]] }
  0xdc   : > { %s730_s1 = scalar_select %p729_p1, %s2125_s28, 1 }
  0xdd   : > { %s2831_s20 = sld [smem:[#allocation31_spill]]  ;;  %s2832_s19 = sld [smem:[#allocation33_spill]] }
  0xde   : > { %s1574_s24 = sshll.u32 %s730_s1, 3  ;;  %s1575_s16 = sshll.u32 %s730_s1, 1 }
  0xdf   : > { %p737_p3 = scmp.lt.s32.totalorder %s2828_s18, 3  ;;  %s2834_s8 = sld [smem:[#allocation34_spill]] }
  0xe0   : > { %s732_s11 = scalar_lea.vmem %s2829_s17, %s1574_s24  ;;  %s728_s29 = scalar_lea.vmem [#allocation13], %s2556_s15 }
  0xe1   : > { %s736_s6 = scalar_lea.vmem %s2830_s21, %s1575_s16  ;;  %v2569_v0 = vld [vmem:[%s732_s11] sm:$0xff]  ;;  %s2833_s21 = sld [smem:[#allocation35_spill]] }
  0xe2   : > { %s2567_s9 = scalar_select %p737_p3, %s2828_s18, 3  ;;  %v2573_v1 = vpack.c.bf16 %v2569_v0, %v2569_v0 }
  0xe3   : > { %p1578_p2 = scmp.ne.s32.totalorder %s2828_s18, 0 }
  0xe4   : > { %s739_s1 = scalar_lea.vmem %s2831_s20, %s2567_s9  ;;  %s742_s16 = scalar_lea.vmem %s2832_s19, %s2567_s9  ;;  %vm758_vm0 = vcmask (!%p1578_p2), 261120   ;;  %v760_v2 = vld [vmem:[%s736_s6] sm:$0x3] (!%p1578_p2)  ;;  %v2146_v3 = vmov (!%p1578_p2), 0.0   ;;  %vm764_vm1 = vcmask (!%p1578_p2), 64512  }
  0xe5   : > { %s1614_s17 = sshll.u32 %s2567_s9, 4  ;;  %757 = sbr.rel (%p1578_p2) target bundleno = 236 (0xec), region = 108  ;;  %759 = vst.msk [vmem:[#allocation2] sm:$0xff] (!%p1578_p2), %vm758_vm0, %v2146_v3  ;;  %v761_v4 = vunpack.c.0.s8 (!%p1578_p2), %v760_v2  ;;  %v2147_v5 = vmov (!%p1578_p2), -1e+09  }
  0xe6   : > { %s2591_s14 = scalar_lea.vmem %s2834_s8, %s1614_s17 }
  0xe7   : > { %s750_s10 = scalar_lea.vmem %s2833_s21, %s2567_s9  ;;  %vm762_vm2 = vcmp.gt.s32.totalorder (!%p1578_p2), %v761_v4, 0 }
  0xe8   : > { %v763_v6 = vsel (!%p1578_p2), %vm762_vm2, 0.0, %v2147_v5 }
  0xe9   : > { %765 = vst.msk [vmem:[#allocation3] sm:$0xff] (!%p1578_p2), %vm764_vm1, %v763_v6 }
  0xec PF: > { %v1841_v7 = vld [vmem:[%s2540_s7] sm:$0xff]   ;;  %v2148_v8 = vmov 0.0   ;;  %v1842_v9 = vld [vmem:[%s2540_s7 + $0x8] sm:$0xff]   ;;  %vm2149_vm3 = vmmov 0   ;;  %vm789_vm4 = vcmask 261120   ;;  %vm962_vm5 = vcmask 64512  }
  0xed   : > { %1646 = vmatprep.subr.bf16.mxu1 %v2148_v8  ;;  %1638 = vmatprep.subr.bf16.mxu0 %v2148_v8  ;;  %v1843_v10 = vld [vmem:[%s2533_s12] sm:$0xff]   ;;  %v1844_v11 = vld [vmem:[%s2533_s12 + $0x8] sm:$0xff]   ;;  %vm1025_vm6 = vcmask 1043456  }
  0xee   : > { %1647 = vmatpush3.bf16.msra.mxu1 %v1841_v7  ;;  %1650 = vmatprep.mubr.msk.bf16.mxu1 %vm2149_vm3, %v2148_v8  ;;  %v1583_v12 = vld [vmem:[%s742_s16] ss:$0 sm:$0xff]  ;;  %v1846_v28 = vld [vmem:[%s2591_s14 + $0x8] sm:$0xff]   ;;  %v1071_v49 = vld [vmem:[%s2546_s27] sm:$0xf]  ;;  %s2838_s27 = sld [smem:[#allocation20_spill]] }
  0xef   : > { %1648 = vmatprep.subr.bf16.mxu1 %v2148_v8  ;;  %1642 = vmatprep.mubr.msk.bf16.mxu0 %vm2149_vm3, %v2148_v8  ;;  %v1579_v17 = vld [vmem:[%s739_s1] ss:$0 sm:$0xff]  ;;  %v1076_v50 = vsel %vm1025_vm6, %v1071_v49, 0 }
  0xf0   : > { %1639 = vmatpush3.bf16.msra.mxu0 %v1843_v10  ;;  %v1845_v27 = vld [vmem:[%s2591_s14] sm:$0xff]   ;;  %v961_v29 = vld [vmem:[#allocation3] sm:$0xff] }
  0xf1   : > { %1640 = vmatprep.subr.bf16.mxu0 %v2148_v8  ;;  %v1587_v44 = vld [vmem:[%s750_s10] ss:$0 sm:$0xff] }
  0xf2   : > { %1649 = vmatpush3.bf16.msra.mxu1 %v1842_v9  ;;  %v1069_v60 = vld [vmem:[#allocation2] sm:$0xff] }
  0xf3   : > { %1662 = vmatprep.subr.bf16.mxu1 %v2148_v8 }
  0xf4   : > { %1641 = vmatpush3.bf16.msra.mxu0 %v1844_v11  ;;  %p1594_p0 = scmp.ne.s32.totalorder %s2838_s27, 3 }
  0xf5   : > { %1651 = vmatmul.mubr.msk.bf16.vlgmr.msra.gmra.mrb[0].mxu1 %vm789_vm4, %v2573_v1  ;;  %1654 = vmatprep.subr.bf16.mxu0 %v2148_v8  ;;  %s2839_s20 = sld [smem:[#allocation37_spill]] (!%p1594_p0)  ;;  %vm2151_vm7 = vmmov (!%p1594_p0), 0   ;;  %s2840_s3 = sld [smem:[#allocation38_spill]] (!%p1594_p0)  ;;  %vm1272_vm8 = vcmask (!%p1594_p0), 523264  }
  0xf6   : > { %1664 = vmatprep.mubr.msk.bf16.mxu1 %vm2149_vm3, %v2148_v8  ;;  %s2841_s17 = sld [smem:[#allocation39_spill]] (!%p1594_p0)  ;;  %s2842_s21 = sld [smem:[#allocation41_spill]] (!%p1594_p0) }
  0xf7   : > { %1643 = vmatmul.mubr.msk.bf16.vlgmr.msra.gmra.mrb[0].mxu0 %vm789_vm4, %v2573_v1  ;;  %s2843_s8 = sld [smem:[#allocation43_spill]] (!%p1594_p0) }
  0xf8   : > { %1658 = vmatprep.mubr.msk.bf16.mxu0 %vm2149_vm3, %v2148_v8  ;;  %1655 = vmatpush3.bf16.msra.mxu0 %v1845_v27  ;;  %v1855_v27 = vld [vmem:[#allocation12 + $0x10] sm:$0xff] (!%p1594_p0)  }
  0xf9   : > { %1656 = vmatprep.subr.bf16.mxu0 %v2148_v8 }
  0xfb   : > { %v1595_v4 = vld [vmem:[%s2839_s20] ss:$0 sm:$0xff] (!%p1594_p0) }
  0xfc   : > { %1657 = vmatpush3.bf16.msra.mxu0 %v1846_v28  ;;  %v1856_v28 = vld [vmem:[#allocation12 + $0x18] sm:$0xff] (!%p1594_p0)  }
  0xfd   : > { %1668 = vmatprep.subr.bf16.mxu0 %v2148_v8 }
  0xff   : > { %1659 = vmatmul.mubr.msk.bf16.vlgmr.msra.gmra.mrb[4].mxu0 %vm789_vm4, %v2573_v1 }
 0x100   : > { %1670 = vmatprep.mubr.msk.bf16.mxu0 %vm2149_vm3, %v2148_v8 }
 0x1c8   : > { %v890_v13 = vpop.f32.mrb[0].mxu1 }
 0x1c9   : > { %v891_v14 = vadd.f32 %v1583_v12, %v890_v13  ;;  %v1652_v15 = vpop.f32.mrb[1].mxu1  ;;  %v1851_v13 = vld [vmem:[#allocation10] sm:$0xff] (!%p1594_p0)  }
 0x1ca   : > { %v893_v16 = vpop.f32.mrb[2].mxu1  ;;  %v827_v18 = vpop.f32.mrb[0].mxu0  ;;  %v1852_v15 = vld [vmem:[#allocation10 + $0x8] sm:$0xff] (!%p1594_p0)  }
 0x1cb   : > { %v960_v19 = vpack.c.bf16 %v891_v14, %v891_v14  ;;  %v1653_v20 = vpop.f32.mrb[3].mxu1  ;;  %v1644_v21 = vpop.f32.mrb[1].mxu0  ;;  %v828_v24 = vadd.f32 %v1579_v17, %v827_v18  ;;  %v2150_v14 = vmov (!%p1594_p0), 0.0   ;;  %v1854_v16 = vld [vmem:[#allocation12 + $0x8] sm:$0xff] (!%p1594_p0)  }
 0x1cc   : > { %v830_v22 = vpop.f32.mrb[2].mxu0  ;;  %v1596_v21 = vld [vmem:[%s2840_s3] ss:$0 sm:$0xff] (!%p1594_p0) }
 0x1cd   : > { %v967_v23 = vsel %vm962_vm5, %v960_v19, 0  ;;  %v1645_v25 = vpop.f32.mrb[3].mxu0  ;;  %v959_v26 = vpack.c.bf16 %v828_v24, %v828_v24 }
 0x1ce   : > { %1663 = vmatpush3.bf16.xpose.msra.mxu1 %v967_v23  ;;  %v1597_v23 = vld [vmem:[%s2841_s17] ss:$0 sm:$0xff] (!%p1594_p0) }
 0x1cf   : > { %1674 = vmatprep.subr.bf16.mxu1 %v2148_v8 }
 0x1d2   : > { %v953_v41 = vpop.f32.mrb[4].mxu0 }
 0x1d3   : > { %v1660_v42 = vpop.f32.mrb[5].mxu0  ;;  %v954_v46 = vadd.f32 %v1587_v44, %v953_v41 }
 0x1d4   : > { %v956_v43 = vpop.f32.mrb[6].mxu0 }
 0x1d5   : > { %1665 = vmatmul.mubr.msk.bf16.vlgmr.msra.gmra.mrb[4].mxu1 %vm962_vm5, %v959_v26  ;;  %v1661_v45 = vpop.f32.mrb[7].mxu0  ;;  %v1021_v47 = vpack.c.bf16 %v954_v46, %v954_v46 }
 0x1d6   : > { %1676 = vmatprep.mubr.msk.bf16.mxu1 %vm2149_vm3, %v2148_v8  ;;  %1675 = vmatpush3.bf16.msra.mxu1 %v1076_v50 }
 0x1d7   : > { %v1027_v48 = vsel %vm1025_vm6, %v1021_v47, 0  ;;  %1688 = vmatprep.subr.bf16.mxu1 (!%p1594_p0), %v2150_v14 }
 0x1d8   : > { %1669 = vmatpush3.bf16.msra.mxu0 %v1027_v48 }
 0x1d9   : > { %1680 = vmatprep.subr.bf16.mxu0 (!%p1594_p0), %v2150_v14 }
 0x2a8   : > { %v1003_v30 = vpop.f32.mrb[4].mxu1 }
 0x2a9   : > { %v1004_v31 = vadd.f32 %v1003_v30, %v961_v29  ;;  %v1666_v32 = vpop.f32.mrb[5].mxu1  ;;  %v1598_v29 = vld [vmem:[%s2842_s21] ss:$0 sm:$0xff] (!%p1594_p0) }
 0x2aa   : > { %v1006_v33 = vpop.f32.mrb[6].mxu1 }
 0x2ab   : > { %v1667_v34 = vpop.f32.mrb[7].mxu1  ;;  %v1009_v35 = vsel %vm962_vm5, %v1004_v31, -inf }
 0x2ac   : > { %1010 = vmax.xlane.f32.xlu0 %v1009_v35 }
 0x339   : > { %v1011_v36 = vpop.xlane.xlu0 %1010 }
 0x33a   : > { %v1012_v37 = vsub.f32 %v1004_v31, %v1011_v36 }
 0x33c   : > { %v1013_v38 = vmul.f32 1.442695, %v1012_v37  ;;  %v1602_v37 = vld [vmem:[%s2843_s8] ss:$0 sm:$0xff] (!%p1594_p0) }
 0x33e   : > { %1847 = vpow2.f32 %v1013_v38 }
 0x348   : > { %v1848_v39 = vpop.eup %1847 }
 0x349   : > { %v1015_v40 = vsel %vm962_vm5, %v1848_v39, 0.0 }
 0x34a   : > { %1016 = vadd.xlane.f32.xlu0 %v1015_v40 }
 0x3d7   : > { %v1017_v51 = vpop.xlane.xlu0 %1016 }
 0x3d8   : > { %1849 = vrcp.f32 %v1017_v51 }
 0x3e2   : > { %v1850_v52 = vpop.eup %1849 }
 0x3e3   : > { %v1019_v53 = vmul.f32 %v1850_v52, %v1848_v39 }
 0x3e5   : > { %v1020_v54 = vpack.c.bf16 %v1019_v53, %v1019_v53 }
 0x3e7   : > { %1671 = vmatmul.mubr.msk.bf16.vlgmr.msra.gmra.mrb[8].mxu0 %vm962_vm5, %v1020_v54 }
 0x3e8   : > { %1684 = vmatprep.mubr.msk.bf16.mxu0 (!%p1594_p0), %vm2151_vm7, %v2150_v14  ;;  %1681 = vmatpush3.bf16.msra.mxu0 (!%p1594_p0), %v1851_v13 }
 0x3e9   : > { %1682 = vmatprep.subr.bf16.mxu0 (!%p1594_p0), %v2150_v14 }
 0x3ec   : > { %1683 = vmatpush3.bf16.msra.mxu0 (!%p1594_p0), %v1852_v15 }
 0x4ba   : > { %v1063_v55 = vpop.f32.mrb[8].mxu0 }
 0x4bb   : > { %v1070_v56 = vpack.c.bf16 %v1063_v55, %v1063_v55  ;;  %v1672_v57 = vpop.f32.mrb[9].mxu0 }
 0x4bc   : > { %v1066_v58 = vpop.f32.mrb[10].mxu0 }
 0x4bd   : > { %v1673_v59 = vpop.f32.mrb[11].mxu0  ;;  %1677 = vmatmul.mubr.msk.bf16.vlgmr.msra.gmra.mrb[8].mxu1 %vm962_vm5, %v1070_v56 }
 0x4be   : > { %1696 = vmatprep.mubr.msk.bf16.mxu1 (!%p1594_p0), %vm2151_vm7, %v2150_v14 }
 0x58d   : > { %1123 = sbr.rel (%p1594_p0) target bundleno = 2502 (0x9c6), region = 112 }
 0x590   : > { %v1112_v61 = vpop.f32.mrb[8].mxu1 }
 0x591   : > { %v1118_v62 = vadd.f32 %v1112_v61, %v1069_v60  ;;  %v1678_v63 = vpop.f32.mrb[9].mxu1 }
 0x592   : > { %v1115_v1 = vpop.f32.mrb[10].mxu1 }
 0x593   : > { %1119 = vst.msk [vmem:[#allocation2] sm:$0xff] %vm789_vm4, %v1118_v62  ;;  %v1679_v2 = vpop.f32.mrb[11].mxu1 }
 0x59a   : > { %v1126_v3 = vld [vmem:[#allocation2] sm:$0xff] }
 0x59b   : > { %v1134_v5 = vadd.f32 %v1595_v4, %v1126_v3 }
 0x59d   : > { %v1135_v6 = vadd.f32 %v1134_v5, %v2569_v0  ;;  %v1853_v0 = vld [vmem:[#allocation12] sm:$0xff]  }
 0x59e   : > { %1689 = vmatpush3.bf16.msra.mxu1 %v1853_v0 }
 0x59f   : > { %v1136_v7 = vsel %vm789_vm4, %v1135_v6, 0.0  ;;  %1690 = vmatprep.subr.bf16.mxu1 %v2150_v14 }
 0x5a0   : > { %1137 = vadd.xlane.f32.xlu0 %v1136_v7 }
 0x5a2   : > { %1691 = vmatpush3.bf16.msra.mxu1 %v1854_v16 }
 0x5a3   : > { %1692 = vmatprep.subr.bf16.mxu1 %v2150_v14 }
 0x5a6   : > { %1693 = vmatpush3.bf16.msra.mxu1 %v1855_v27 }
 0x5a7   : > { %1694 = vmatprep.subr.bf16.mxu1 %v2150_v14 }
 0x5aa   : > { %1695 = vmatpush3.bf16.msra.mxu1 %v1856_v28 }
 0x62d   : > { %v1138_v8 = vpop.xlane.xlu0 %1137 }
 0x62e   : > { %v1140_v9 = vmul.f32 0.03125, %v1138_v8 }
 0x630   : > { %v1141_v10 = vsub.f32 %v1135_v6, %v1140_v9 }
 0x632   : > { %v1142_v11 = vmul.f32 %v1141_v10, %v1141_v10 }
 0x634   : > { %v1143_v12 = vsel %vm789_vm4, %v1142_v11, 0.0 }
 0x635   : > { %1144 = vadd.xlane.f32.xlu0 %v1143_v12 }
 0x6c2   : > { %v1145_v17 = vpop.xlane.xlu0 %1144 }
 0x6c3   : > { %v1146_v18 = vmul.f32 0.03125, %v1145_v17 }
 0x6c5   : > { %v1147_v19 = vadd.f32 1e-05, %v1146_v18 }
 0x6c7   : > { %1857 = vrsqrt.f32 %v1147_v19 }
 0x6d1   : > { %v1858_v20 = vpop.eup %1857 }
 0x6d2   : > { %v1149_v22 = vmul.f32 %v1858_v20, %v1141_v10 }
 0x6d4   : > { %v1156_v24 = vmul.f32 %v1596_v21, %v1149_v22 }
 0x6d6   : > { %v1163_v25 = vadd.f32 %v1597_v23, %v1156_v24 }
 0x6d8   : > { %v1164_v26 = vpack.c.bf16 %v1163_v25, %v1163_v25 }
 0x6da   : > { %1685 = vmatmul.mubr.msk.bf16.vlgmr.msra.gmra.mrb[0].mxu0 %vm789_vm4, %v1164_v26 }
 0x7ad   : > { %v1225_v30 = vpop.f32.mrb[0].mxu0 }
 0x7ae   : > { %v1226_v31 = vadd.f32 %v1598_v29, %v1225_v30  ;;  %v1686_v32 = vpop.f32.mrb[1].mxu0 }
 0x7af   : > { %v1228_v33 = vpop.f32.mrb[2].mxu0 }
 0x7b0   : > { %v1231_v34 = vmax.f32 %v1226_v31, 0.0  ;;  %v1687_v35 = vpop.f32.mrb[3].mxu0 }
 0x7b2   : > { %v1232_v36 = vpack.c.bf16 %v1231_v34, %v1231_v34 }
 0x7b4   : > { %1697 = vmatmul.mubr.msk.bf16.vlgmr.msra.gmra.mrb[0].mxu1 %vm1272_vm8, %v1232_v36 }
 0x887   : > { %v1310_v38 = vpop.f32.mrb[0].mxu1 }
 0x888   : > { %v1311_v39 = vadd.f32 %v1602_v37, %v1310_v38  ;;  %v1698_v40 = vpop.f32.mrb[1].mxu1 }
 0x889   : > { %v1313_v41 = vpop.f32.mrb[2].mxu1 }
 0x88a   : > { %v1699_v42 = vpop.f32.mrb[3].mxu1  ;;  %v1316_v43 = vadd.f32 %v1311_v39, %v1163_v25 }
 0x88c   : > { %v1317_v44 = vsel %vm789_vm4, %v1316_v43, 0.0 }
 0x88d   : > { %1318 = vadd.xlane.f32.xlu1 %v1317_v44 }
 0x91a   : > { %v1319_v45 = vpop.xlane.xlu1 %1318 }
 0x91b   : > { %v1320_v46 = vmul.f32 0.03125, %v1319_v45 }
 0x91d   : > { %v1321_v47 = vsub.f32 %v1316_v43, %v1320_v46 }
 0x91f   : > { %v1322_v48 = vmul.f32 %v1321_v47, %v1321_v47 }
 0x921   : > { %v1323_v49 = vsel %vm789_vm4, %v1322_v48, 0.0 }
 0x922   : > { %1324 = vadd.xlane.f32.xlu1 %v1323_v49 }
 0x9af   : > { %v1325_v50 = vpop.xlane.xlu1 %1324 }
 0x9b0   : > { %v1326_v51 = vmul.f32 0.03125, %v1325_v50 }
 0x9b2   : > { %v1327_v52 = vadd.f32 1e-05, %v1326_v51 }
 0x9b4   : > { %1859 = vrsqrt.f32 %v1327_v52 }
 0x9be   : > { %v1860_v53 = vpop.eup %1859 }
 0x9bf   : > { %v1329_v54 = vmul.f32 %v1860_v53, %v1321_v47 }
 0x9c1   : > { %v1330_v55 = vmul.f32 %v1596_v21, %v1329_v54 }
 0x9c3   : > { %v1331_v56 = vadd.f32 %v1597_v23, %v1330_v55 }
 0x9c5   : > { %1332 = vst.msk [vmem:[%s728_s29] sm:$0xff] %vm789_vm4, %v1331_v56 }
 0x9c6 PF: > { %s2844_s12 = sld [smem:[#allocation23_spill]]  ;;  %s1609_s7 = sshll.u32 %s2125_s28, 7 }
 0x9c7   : > { %s2845_s14 = sld [smem:[#allocation44_spill]]  ;;  %s1347_s4 = sshll.u32 %s728_s29, 4  ;;  %s1348_s4 = int_to_ptr.vmem [resolvable:$true] %s1347_s4 }
 0x9c8   : > { %s2846_s27 = sand.u32 1, %s2101_s22   ;;  %s2007_s9 = scalar_lea.vmem %s1348_s4, 128 }
 0x9c9   : > { %s1334_s10 = scalar_lea.sflag [#allocation6], %s2846_s27  ;;  %p2008_p7 = scmp.ne.s32.totalorder %s1348_s4, %s2007_s9 }
 0x9ca   : > { %s2152_s20 = smov [#allocation13]  }
 0x9cb   : > { %s2011_s1 = sshll.u32 %s2152_s20, 4  ;;  %s2012_s1 = int_to_ptr.vmem [resolvable:$false] %s2011_s1 }
 0x9cc   : > { %p2847_p4 = scmp.ne.s32.totalorder %s2844_s12, 0  ;;  %s2013_s24 = scalar_lea.vmem %s2012_s1, 256 }
 0x9cd   : > { %s2665_s5 = scalar_lea.hbm %s2845_s14, %s1609_s7  ;;  %p2014_p5 = scmp.lt.s32.totalorder %s1348_s4, %s2012_s1 }
 0x9ce   : > { %p2009_p6 = pnand %p2008_p7, %p2847_p4  ;;  %p2015_p8 = scmp.lt.s32.totalorder %s2013_s24, %s2007_s9 }
 0x9d0   : > { %p2010_p10 = pneg %p2009_p6  ;;  %p2016_p12 = por %p2015_p8, %p2014_p5 }
 0x9d2   : > { %p2017_p9 = pnand %p2016_p12, %p2010_p10 }
 0x9d4   : > { %2020 = shalt.err (!%p2017_p9)
}
 0x9d5   : > { %s2021_s28 = scalar_lea.hbm %s2665_s5, 128  ;;  %s2025_s3 = scalar_lea.hbm %s2845_s14, 256 }
 0x9d6   : > { %p2022_p13 = scmp.ne.s32.totalorder %s2665_s5, %s2021_s28  ;;  %p2026_p3 = scmp.lt.u32.totalorder %s2665_s5, %s2845_s14 }
 0x9d7   : > { %p2027_p2 = scmp.lt.u32.totalorder %s2025_s3, %s2021_s28  ;;  %p2029_p7 = scmp.lt.u32.totalorder %s2021_s28, %s2665_s5 }
 0x9d8   : > { %p2023_p11 = pnand %p2022_p13, %p2847_p4 }
 0x9d9   : > { %p2028_p0 = por %p2027_p2, %p2026_p3 }
 0x9da   : > { %p2024_p1 = pneg %p2023_p11 }
 0x9db   : > { %p2030_p6 = por %p2029_p7, %p2028_p0 }
 0x9dd   : > { %p2031_p10 = pnand %p2030_p6, %p2024_p1 }
 0x9df   : > { %2034 = shalt.err (!%p2031_p10)
}
 0x9e0   : > { %1714 = dma.vmem_to_hbm [thread:$0]  (%p2847_p4), %s1348_s4, 128, %s2665_s5, %s1334_s10  }
 0x9e1 PF: > { %s2848_s17 = sld [smem:[#allocation18_spill]]  ;;  %s2849_s30 = sld [smem:[#allocation24_spill]] }
 0x9e2   : > { %p1742_p5 = scmp.ge.s32.totalorder %s2137_s0, 2 }
 0x9e7   : > { %s1359_s26 = sand.u32 1, %s2848_s17   ;;  %p2850_p8 = scmp.ne.s32.totalorder %s2849_s30, 0 }
 0x9e8   : > { %s1360_s21 = scalar_lea.sflag [#allocation6], %s1359_s26 }
 0x9e9   : > { %p1734_p12 = pnand %p1742_p5, %p2850_p8 }
 0x9eb   : > { %2092 = dma.done.wait (!%p1734_p12), %s1360_s21, 128  }
 0x9ec   : > { %2094 = vsyncadd (!%p1734_p12), %s1360_s21, 4294967168  ;;  %s36_s0 = sadd.s32 1, %s2137_s0   ;;  %s2851_s11 = sld [smem:[#allocation19_spill]] }
 0x9ed   : > { %p33_p9 = scmp.ge.s32.totalorder %s36_s0, 10   ;;  %s2852_s26 = sld [smem:[#allocation27_spill]] }
 0x9ee   : > { %s2853_s27 = sld [smem:[#allocation21_spill]]  ;;  %s2854_s28 = sld [smem:[#allocation22_spill]] }
 0x9ef   : > { %s2855_s29 = sld [smem:[#allocation25_spill]]  ;;  %s2856_s30 = sld [smem:[#allocation26_spill]] }
 0x9f0   : > { %s2857_s21 = smov %s2101_s22  ;;  %s2858_s22 = smov %s2105_s23 }
 0x9f1   : > { %s2859_s23 = smov %s2396_s13  ;;  %s2860_s24 = smov %s2113_s25 }
 0x9f2   : > { %s2861_s25 = smov %s2851_s11  ;;  %35 = sbr.rel (!%p33_p9) target bundleno = 30 (0x1e), region = 187 }
 0x9f9   :  { %1365 = vsyncpa [#allocation5], 1 }
 0x9fa   :  { %1367 = vsyncpa [#allocation5 + $0x1], 1 }
 0x9fb   :  { %1368 = vsyncpa [#allocation8], 1 }
 0x9fc   :  { %1370 = vsyncpa [#allocation8 + $0x1], 1 }
 0x9fd   :  { %1371 = vsyncpa [#allocation11], 1 }
 0x9fe   :  { %1372 = vsyncpa [#allocation6], 1 }
 0x9ff   :  { %1374 = vsyncpa [#allocation6 + $0x1], 1 }

</bundles_post_ra>
